<compile_context>
chip_gen: v5e
topology: v5e:2x2
jax: 0.10.0
libtpu: 0.0.40
codegen_flags: <defaults>
</compile_context>

<pallas_src>
import jax
import jax.numpy as jnp
from jax.experimental import pallas as pl
from jax.experimental.pallas import tpu as pltpu


def nlp_rnn_kernel(idxt_ref, scal_ref, emb_ref, wih_ref, out_ref):
    # idxt_ref: (T, B) int32  VMEM   transposed token ids for ONE problem (this grid step)
    # scal_ref: (2,)   f32    SMEM   [w_hh, b_ih + b_hh]
    # emb_ref : (V, D) f32    VMEM   embedding table (resident across grid steps)
    # wih_ref : (1, D) f32    VMEM   RNN input weight row
    # out_ref : (1, B) f32    VMEM   lane-packed outputs (wrapper reshapes to (B, 1))
    T, B = idxt_ref.shape
    V, D = emb_ref.shape

    whh = scal_ref[0]                     # scalar recurrent weight   (SMEM)
    bias = scal_ref[1]                    # scalar b_ih + b_hh        (SMEM)
    inv_t = 1.0 / T

    # ---- Phase 1a: per-vocab score vector  s[v] = sum_d emb[v, d] * w_ih[d] ----
    # One VPU multiply over the (V, D) table + one lane (XLU) reduce.
    s = jnp.sum(emb_ref[...] * wih_ref[...], axis=1, keepdims=True)        # (V, 1)

    # ---- Phase 1b: transposed token-count matrix  cnt[v, b] = #{t : idx[b, t] == v} ----
    # Vectorized iota-compare accumulation; no scalar-addressed gathers at all.
    idxt = idxt_ref[...]                                                    # (T, B)
    viota = jax.lax.broadcasted_iota(jnp.int32, (V, B), 0)                  # sublane = vocab id
    cnt = jnp.zeros((V, B), jnp.float32)
    for t in range(T):                                                      # static, T = 8
        cnt = cnt + (viota == idxt[t:t + 1, :]).astype(jnp.float32)

    # ---- Phase 1c: z_b = bias + (1/T) * sum_v cnt[v, b] * s[v]  (lane-packed (1, B)) ----
    # One broadcast multiply, ONE sublane reduce, ONE fused scale+bias for the whole batch.
    z = jnp.sum(cnt * s, axis=0, keepdims=True) * inv_t + bias              # (1, B)

    # ---- Phase 2: serial recurrence (batch dim acts as RNN time, hidden = 1) ----
    # Irreducible EUP tanh chain of length B; per-step lane slice of the packed z,
    # hidden states packed once at the end (no per-iteration compare + where).
    h = jnp.zeros((1, 1), jnp.float32)
    hs = []
    for t in range(B):                                                      # static, B = 8
        h = jnp.tanh(z[:, t:t + 1] + whh * h)
        hs.append(h)

    # ---- Phase 3: one vectorized outer tanh + single lane-dense store ----
    out_ref[...] = jnp.tanh(jnp.concatenate(hs, axis=1))                    # (1, B)


def nlp_rnn_forward_batched(idx, emb, w_ih, w_hh, b_ih, b_hh):
    """idx: (N, B, T) ints — N independent problems in one pallas_call (grid axis).

    Returns (N, B, 1) float32, each slice matching NlpRnn.forward(x, y=None).
    """
    N, B, T = idx.shape
    V, D = emb.shape

    idx_t = jnp.swapaxes(idx.astype(jnp.int32), 1, 2)                       # (N, T, B)
    scal = jnp.concatenate(
        [w_hh.reshape(1), (b_ih + b_hh).reshape(1)]).astype(jnp.float32)    # (2,)
    wih_row = w_ih.reshape(1, D).astype(jnp.float32)

    out = pl.pallas_call(
        nlp_rnn_kernel,
        out_shape=jax.ShapeDtypeStruct((N, 1, B), jnp.float32),
        grid=(N,),
        in_specs=[
            pl.BlockSpec((None, T, B), lambda n: (n, 0, 0)),                # per-problem ids
            pl.BlockSpec(memory_space=pltpu.MemorySpace.SMEM),              # [w_hh, bias]
            pl.BlockSpec((V, D), lambda n: (0, 0)),                         # emb (resident)
            pl.BlockSpec((1, D), lambda n: (0, 0)),                         # w_ih (resident)
        ],
        out_specs=pl.BlockSpec((None, 1, B), lambda n: (n, 0, 0)),
        compiler_params=pltpu.CompilerParams(
            dimension_semantics=("parallel",)),                             # v7x: split over TCs
    )(idx_t, scal, emb.astype(jnp.float32), wih_row)

    return out.reshape(N, B, 1)


def nlp_rnn_forward(idx, emb, w_ih, w_hh, b_ih, b_hh):
    """idx: (B, T) ints; returns (B, 1) float32 matching NlpRnn.forward(x, y=None)."""
    return nlp_rnn_forward_batched(idx[None], emb, w_ih, w_hh, b_ih, b_hh)[0]


def nlp_rnn_reference(idx, emb, w_ih, w_hh, b_ih, b_hh):
    """Pure-JAX reference of the same forward pass."""
    e = emb[idx]                          # (B, T, D)
    pooled = jnp.mean(e, axis=1)          # (B, D)
    B = pooled.shape[0]
    h = jnp.zeros((1,), jnp.float32)
    outs = []
    for t in range(B):
        h = jnp.tanh(w_ih @ pooled[t] + b_ih + w_hh[0] * h + b_hh)
        outs.append(h)
    return jnp.tanh(jnp.stack(outs))      # (B, 1)


if __name__ == "__main__":
    # Small shapes consistent with the module:
    #   vocab_len=32, vector_len=32, vocab_count=8 (chars per string), batch=8
    V, D, T, B = 32, 32, 8, 8
    N = 4   # independent forward passes amortized into one pallas_call (grid axis)

    key = jax.random.PRNGKey(0)
    k_idx, k_emb, k_wih, k_whh, k_bih, k_bhh = jax.random.split(key, 6)

    idx = jax.random.randint(k_idx, (N, B, T), 0, V, dtype=jnp.int32)
    emb = jax.random.normal(k_emb, (V, D), dtype=jnp.float32)
    # nn.RNN(vector_len, 1) parameters (uniform init, deterministic)
    w_ih = jax.random.uniform(k_wih, (1, D), jnp.float32, -1.0, 1.0)
    w_hh = jax.random.uniform(k_whh, (1, 1), jnp.float32, -1.0, 1.0)
    b_ih = jax.random.uniform(k_bih, (1,), jnp.float32, -1.0, 1.0)
    b_hh = jax.random.uniform(k_bhh, (1,), jnp.float32, -1.0, 1.0)

    # Single-problem path (grid of 1) — same interface as the PyTorch module.
    out1 = jax.block_until_ready(nlp_rnn_forward(idx[0], emb, w_ih, w_hh, b_ih, b_hh))
    ref1 = nlp_rnn_reference(idx[0], emb, w_ih, w_hh, b_ih, b_hh)
    assert out1.shape == (B, 1), out1.shape
    assert jnp.allclose(out1, ref1, atol=1e-3, rtol=1e-3), (out1, ref1)

    # Batched path: N problems per call, one grid step each ("parallel" axis).
    outN = jax.block_until_ready(
        nlp_rnn_forward_batched(idx, emb, w_ih, w_hh, b_ih, b_hh))
    refN = jnp.stack([nlp_rnn_reference(idx[n], emb, w_ih, w_hh, b_ih, b_hh)
                      for n in range(N)])
    assert outN.shape == (N, B, 1), outN.shape
    assert jnp.allclose(outN, refN, atol=1e-3, rtol=1e-3), (outN, refN)

    print("KERNEL_OK")
</pallas_src>

<mosaic_0001>
module attributes {stable_mosaic.version = 11 : i64} {
  func.func @nlp_rnn_kernel(%arg0: i32, %arg1: memref<1x8x8xi32, #tpu.memory_space<vmem>>, %arg2: memref<2xf32, #tpu.memory_space<smem>>, %arg3: memref<32x32xf32, #tpu.memory_space<vmem>>, %arg4: memref<1x32xf32, #tpu.memory_space<vmem>>, %arg5: memref<1x1x8xf32, #tpu.memory_space<vmem>>) attributes {dimension_semantics = [#tpu.dimension_semantics<parallel>], iteration_bounds = array<i64: 1>, scalar_prefetch = 0 : i64, scratch_operands = 0 : i64, tpu.core_type = #tpu.core_type<tc>, window_params = [{transform_indices = @transform_0, window_bounds = array<i64: 1, 8, 8>}, {transform_indices = @transform_1, window_bounds = array<i64: 2>}, {pipeline_mode = #tpu.pipeline_mode<synchronous>, transform_indices = @transform_2, window_bounds = array<i64: 32, 32>}, {pipeline_mode = #tpu.pipeline_mode<synchronous>, transform_indices = @transform_3, window_bounds = array<i64: 1, 32>}, {transform_indices = @transform_4, window_bounds = array<i64: 1, 1, 8>}]} {
    %c0 = arith.constant 0 : index
    %0 = memref.load %arg2[%c0] : memref<2xf32, #tpu.memory_space<smem>>
    %c1 = arith.constant 1 : index
    %1 = memref.load %arg2[%c1] : memref<2xf32, #tpu.memory_space<smem>>
    %c0_0 = arith.constant 0 : index
    %c0_1 = arith.constant 0 : index
    %2 = vector.load %arg3[%c0_0, %c0_1] : memref<32x32xf32, #tpu.memory_space<vmem>>, vector<32x32xf32>
    %c0_2 = arith.constant 0 : index
    %c0_3 = arith.constant 0 : index
    %3 = vector.load %arg4[%c0_2, %c0_3] : memref<1x32xf32, #tpu.memory_space<vmem>>, vector<1x32xf32>
    %4 = vector.broadcast %3 : vector<1x32xf32> to vector<32x32xf32>
    %5 = arith.mulf %2, %4 : vector<32x32xf32>
    %cst = arith.constant dense<0.000000e+00> : vector<32xf32>
    %6 = vector.multi_reduction <add>, %5, %cst [1] : vector<32x32xf32> to vector<32xf32>
    %7 = vector.shape_cast %6 : vector<32xf32> to vector<32x1xf32>
    %c0_4 = arith.constant 0 : index
    %c0_5 = arith.constant 0 : index
    %c0_6 = arith.constant 0 : index
    %8 = vector.load %arg1[%c0_4, %c0_5, %c0_6] : memref<1x8x8xi32, #tpu.memory_space<vmem>>, vector<1x8x8xi32>
    %9 = vector.shape_cast %8 : vector<1x8x8xi32> to vector<8x8xi32>
    %10 = tpu.iota {dimensions = array<i32: 0>} : vector<32x8xi32>
    %cst_7 = arith.constant 0.000000e+00 : f32
    %11 = vector.broadcast %cst_7 : f32 to vector<32x8xf32>
    %12 = vector.extract_strided_slice %9 {offsets = [0, 0], sizes = [1, 8], strides = [1, 1]} : vector<8x8xi32> to vector<1x8xi32>
    %13 = vector.broadcast %12 : vector<1x8xi32> to vector<32x8xi32>
    %14 = arith.cmpi eq, %10, %13 : vector<32x8xi32>
    %15 = arith.extui %14 : vector<32x8xi1> to vector<32x8xi32>
    %16 = arith.sitofp %15 : vector<32x8xi32> to vector<32x8xf32>
    %17 = arith.addf %11, %16 : vector<32x8xf32>
    %18 = vector.extract_strided_slice %9 {offsets = [1, 0], sizes = [1, 8], strides = [1, 1]} : vector<8x8xi32> to vector<1x8xi32>
    %19 = vector.broadcast %18 : vector<1x8xi32> to vector<32x8xi32>
    %20 = arith.cmpi eq, %10, %19 : vector<32x8xi32>
    %21 = arith.extui %20 : vector<32x8xi1> to vector<32x8xi32>
    %22 = arith.sitofp %21 : vector<32x8xi32> to vector<32x8xf32>
    %23 = arith.addf %17, %22 : vector<32x8xf32>
    %24 = vector.extract_strided_slice %9 {offsets = [2, 0], sizes = [1, 8], strides = [1, 1]} : vector<8x8xi32> to vector<1x8xi32>
    %25 = vector.broadcast %24 : vector<1x8xi32> to vector<32x8xi32>
    %26 = arith.cmpi eq, %10, %25 : vector<32x8xi32>
    %27 = arith.extui %26 : vector<32x8xi1> to vector<32x8xi32>
    %28 = arith.sitofp %27 : vector<32x8xi32> to vector<32x8xf32>
    %29 = arith.addf %23, %28 : vector<32x8xf32>
    %30 = vector.extract_strided_slice %9 {offsets = [3, 0], sizes = [1, 8], strides = [1, 1]} : vector<8x8xi32> to vector<1x8xi32>
    %31 = vector.broadcast %30 : vector<1x8xi32> to vector<32x8xi32>
    %32 = arith.cmpi eq, %10, %31 : vector<32x8xi32>
    %33 = arith.extui %32 : vector<32x8xi1> to vector<32x8xi32>
    %34 = arith.sitofp %33 : vector<32x8xi32> to vector<32x8xf32>
    %35 = arith.addf %29, %34 : vector<32x8xf32>
    %36 = vector.extract_strided_slice %9 {offsets = [4, 0], sizes = [1, 8], strides = [1, 1]} : vector<8x8xi32> to vector<1x8xi32>
    %37 = vector.broadcast %36 : vector<1x8xi32> to vector<32x8xi32>
    %38 = arith.cmpi eq, %10, %37 : vector<32x8xi32>
    %39 = arith.extui %38 : vector<32x8xi1> to vector<32x8xi32>
    %40 = arith.sitofp %39 : vector<32x8xi32> to vector<32x8xf32>
    %41 = arith.addf %35, %40 : vector<32x8xf32>
    %42 = vector.extract_strided_slice %9 {offsets = [5, 0], sizes = [1, 8], strides = [1, 1]} : vector<8x8xi32> to vector<1x8xi32>
    %43 = vector.broadcast %42 : vector<1x8xi32> to vector<32x8xi32>
    %44 = arith.cmpi eq, %10, %43 : vector<32x8xi32>
    %45 = arith.extui %44 : vector<32x8xi1> to vector<32x8xi32>
    %46 = arith.sitofp %45 : vector<32x8xi32> to vector<32x8xf32>
    %47 = arith.addf %41, %46 : vector<32x8xf32>
    %48 = vector.extract_strided_slice %9 {offsets = [6, 0], sizes = [1, 8], strides = [1, 1]} : vector<8x8xi32> to vector<1x8xi32>
    %49 = vector.broadcast %48 : vector<1x8xi32> to vector<32x8xi32>
    %50 = arith.cmpi eq, %10, %49 : vector<32x8xi32>
    %51 = arith.extui %50 : vector<32x8xi1> to vector<32x8xi32>
    %52 = arith.sitofp %51 : vector<32x8xi32> to vector<32x8xf32>
    %53 = arith.addf %47, %52 : vector<32x8xf32>
    %54 = vector.extract_strided_slice %9 {offsets = [7, 0], sizes = [1, 8], strides = [1, 1]} : vector<8x8xi32> to vector<1x8xi32>
    %55 = vector.broadcast %54 : vector<1x8xi32> to vector<32x8xi32>
    %56 = arith.cmpi eq, %10, %55 : vector<32x8xi32>
    %57 = arith.extui %56 : vector<32x8xi1> to vector<32x8xi32>
    %58 = arith.sitofp %57 : vector<32x8xi32> to vector<32x8xf32>
    %59 = arith.addf %53, %58 : vector<32x8xf32>
    %60 = vector.broadcast %7 : vector<32x1xf32> to vector<32x8xf32>
    %61 = arith.mulf %59, %60 : vector<32x8xf32>
    %cst_8 = arith.constant dense<0.000000e+00> : vector<8xf32>
    %62 = vector.multi_reduction <add>, %61, %cst_8 [0] : vector<32x8xf32> to vector<8xf32>
    %63 = vector.shape_cast %62 : vector<8xf32> to vector<1x8xf32>
    %cst_9 = arith.constant 1.250000e-01 : f32
    %64 = vector.broadcast %cst_9 : f32 to vector<1x8xf32>
    %65 = arith.mulf %63, %64 : vector<1x8xf32>
    %66 = vector.broadcast %1 : f32 to vector<1x8xf32>
    %67 = arith.addf %65, %66 : vector<1x8xf32>
    %cst_10 = arith.constant 0.000000e+00 : f32
    %68 = vector.broadcast %cst_10 : f32 to vector<1x1xf32>
    %69 = vector.extract_strided_slice %67 {offsets = [0, 0], sizes = [1, 1], strides = [1, 1]} : vector<1x8xf32> to vector<1x1xf32>
    %70 = vector.broadcast %0 : f32 to vector<1x1xf32>
    %71 = arith.mulf %70, %68 : vector<1x1xf32>
    %72 = arith.addf %69, %71 : vector<1x1xf32>
    %73 = math.tanh %72 : vector<1x1xf32>
    %74 = vector.extract_strided_slice %67 {offsets = [0, 1], sizes = [1, 1], strides = [1, 1]} : vector<1x8xf32> to vector<1x1xf32>
    %75 = vector.broadcast %0 : f32 to vector<1x1xf32>
    %76 = arith.mulf %75, %73 : vector<1x1xf32>
    %77 = arith.addf %74, %76 : vector<1x1xf32>
    %78 = math.tanh %77 : vector<1x1xf32>
    %79 = vector.extract_strided_slice %67 {offsets = [0, 2], sizes = [1, 1], strides = [1, 1]} : vector<1x8xf32> to vector<1x1xf32>
    %80 = vector.broadcast %0 : f32 to vector<1x1xf32>
    %81 = arith.mulf %80, %78 : vector<1x1xf32>
    %82 = arith.addf %79, %81 : vector<1x1xf32>
    %83 = math.tanh %82 : vector<1x1xf32>
    %84 = vector.extract_strided_slice %67 {offsets = [0, 3], sizes = [1, 1], strides = [1, 1]} : vector<1x8xf32> to vector<1x1xf32>
    %85 = vector.broadcast %0 : f32 to vector<1x1xf32>
    %86 = arith.mulf %85, %83 : vector<1x1xf32>
    %87 = arith.addf %84, %86 : vector<1x1xf32>
    %88 = math.tanh %87 : vector<1x1xf32>
    %89 = vector.extract_strided_slice %67 {offsets = [0, 4], sizes = [1, 1], strides = [1, 1]} : vector<1x8xf32> to vector<1x1xf32>
    %90 = vector.broadcast %0 : f32 to vector<1x1xf32>
    %91 = arith.mulf %90, %88 : vector<1x1xf32>
    %92 = arith.addf %89, %91 : vector<1x1xf32>
    %93 = math.tanh %92 : vector<1x1xf32>
    %94 = vector.extract_strided_slice %67 {offsets = [0, 5], sizes = [1, 1], strides = [1, 1]} : vector<1x8xf32> to vector<1x1xf32>
    %95 = vector.broadcast %0 : f32 to vector<1x1xf32>
    %96 = arith.mulf %95, %93 : vector<1x1xf32>
    %97 = arith.addf %94, %96 : vector<1x1xf32>
    %98 = math.tanh %97 : vector<1x1xf32>
    %99 = vector.extract_strided_slice %67 {offsets = [0, 6], sizes = [1, 1], strides = [1, 1]} : vector<1x8xf32> to vector<1x1xf32>
    %100 = vector.broadcast %0 : f32 to vector<1x1xf32>
    %101 = arith.mulf %100, %98 : vector<1x1xf32>
    %102 = arith.addf %99, %101 : vector<1x1xf32>
    %103 = math.tanh %102 : vector<1x1xf32>
    %104 = vector.extract_strided_slice %67 {offsets = [0, 7], sizes = [1, 1], strides = [1, 1]} : vector<1x8xf32> to vector<1x1xf32>
    %105 = vector.broadcast %0 : f32 to vector<1x1xf32>
    %106 = arith.mulf %105, %103 : vector<1x1xf32>
    %107 = arith.addf %104, %106 : vector<1x1xf32>
    %108 = math.tanh %107 : vector<1x1xf32>
    %109 = tpu.concatenate %73, %78, %83, %88, %93, %98, %103, %108 in 1 : vector<1x1xf32>, vector<1x1xf32>, vector<1x1xf32>, vector<1x1xf32>, vector<1x1xf32>, vector<1x1xf32>, vector<1x1xf32>, vector<1x1xf32> -> vector<1x8xf32>
    %110 = math.tanh %109 : vector<1x8xf32>
    %c0_11 = arith.constant 0 : index
    %c0_12 = arith.constant 0 : index
    %c0_13 = arith.constant 0 : index
    %111 = vector.load %arg5[%c0_11, %c0_12, %c0_13] : memref<1x1x8xf32, #tpu.memory_space<vmem>>, vector<1x1x8xf32>
    %112 = vector.shape_cast %111 : vector<1x1x8xf32> to vector<1x8xf32>
    %113 = vector.shape_cast %110 : vector<1x8xf32> to vector<1x1x8xf32>
    tpu.vector_store %arg5[%c0_11, %c0_12, %c0_13], %113 {strides = array<i32>} : memref<1x1x8xf32, #tpu.memory_space<vmem>>, vector<1x1x8xf32>,
    return
  }
  func.func @transform_0(%arg0: i32) -> (i32, i32, i32) {
    %c0_i32 = arith.constant 0 : i32
    %c0_i32_0 = arith.constant 0 : i32
    %c0_i32_1 = arith.constant 0 : i32
    return %arg0, %c0_i32, %c0_i32_0 : i32, i32, i32
  }
  func.func @transform_1(%arg0: i32) -> i32 {
    %c0_i32 = arith.constant 0 : i32
    %c0_i32_0 = arith.constant 0 : i32
    return %c0_i32 : i32
  }
  func.func @transform_2(%arg0: i32) -> (i32, i32) {
    %c0_i32 = arith.constant 0 : i32
    %c0_i32_0 = arith.constant 0 : i32
    %c0_i32_1 = arith.constant 0 : i32
    return %c0_i32, %c0_i32_0 : i32, i32
  }
  func.func @transform_3(%arg0: i32) -> (i32, i32) {
    %c0_i32 = arith.constant 0 : i32
    %c0_i32_0 = arith.constant 0 : i32
    %c0_i32_1 = arith.constant 0 : i32
    return %c0_i32, %c0_i32_0 : i32, i32
  }
  func.func @transform_4(%arg0: i32) -> (i32, i32, i32) {
    %c0_i32 = arith.constant 0 : i32
    %c0_i32_0 = arith.constant 0 : i32
    %c0_i32_1 = arith.constant 0 : i32
    return %arg0, %c0_i32, %c0_i32_0 : i32, i32, i32
  }
}

</mosaic_0001>

<bundles_post_ra>
// kernel: tpu_custom_call.1
= control target key start
LH: loop header
LB: loop body
LE: loop exit
PB: predicated region body
PF: predicated region fallthrough
CT: control target
= control target key end

     0   :  { %9 = vsyncpa [#allocation3], 0  ;;  %s632_s0 = inlined_call_operand.hbm [shape: s32[1,8,8], index: 0, kind: input, shape index: {}]   ;;  %s633_s1 = inlined_call_operand.hbm [shape: f32[2], index: 1, kind: input, shape index: {}]   ;;  %s634_s2 = inlined_call_operand.hbm [shape: f32[32,32], index: 2, kind: input, shape index: {}]   ;;  %s635_s3 = inlined_call_operand.vmem [shape: f32[1,32], index: 3, kind: input, shape index: {}]   ;;  %s636_s4 = inlined_call_operand.hbm [shape: f32[1,1,8], index: 4, kind: output, shape index: {}]  }
   0x1   :  { %10 = vsyncpa [#allocation5], 0 }
   0x2   :  { %11 = vsyncpa [#allocation8], 0 }
   0x3   :  { %12 = vsyncpa [#allocation4], 0  ;;  %s18_s17 = sshll.u32 %s632_s0, 4  ;;  %s492_s18 = smov [#allocation2]   ;;  %s19_s17 = int_to_ptr.hbm [resolvable:$true] %s18_s17 }
   0x4   :  { %s20_s19 = sshll.u32 %s492_s18, 4  ;;  %s29_s22 = sshll.u32 %s633_s1, 4  ;;  %s21_s19 = int_to_ptr.vmem [resolvable:$true] %s20_s19  ;;  %s30_s22 = int_to_ptr.hbm [resolvable:$true] %s29_s22 }
   0x5   :  { %23 = dma.hbm_to_vmem [thread:$0]  %s19_s17, 128, %s21_s19, [#allocation3]  }
   0x6   :  { %s493_s23 = smov [#allocation6]   ;;  %s37_s26 = sshll.u32 %s634_s2, 4  ;;  %s38_s26 = int_to_ptr.hbm [resolvable:$true] %s37_s26 }
   0x7   :  { %32 = dma.hbm_to_smem %s30_s22, 16, %s493_s23, [#allocation5]  }
   0x8   :  { %s494_s27 = smov [#allocation7]   ;;  %s495_s0 = smov 128  }
   0x9   :  { %s39_s28 = sshll.u32 %s494_s27, 4  ;;  %s496_s29 = smov 8   ;;  %s40_s28 = int_to_ptr.vmem [resolvable:$true] %s39_s28 }
   0xa   :  { %45 = dma.hbm_to_vmem [thread:$0]  %s38_s26, 512, %s40_s28, [#allocation8], %s495_s0, %s495_s0, %s496_s29  }
   0xb   :  { %484 = dma.done.wait [#allocation3], 128  }
   0xc   :  { %485 = vsyncadd [#allocation3], 4294967168 }
   0xd   :  { %486 = dma.done.wait [#allocation5], 16  }
   0xe   :  { %487 = vsyncadd [#allocation5], 4294967280 }
   0xf   :  { %488 = dma.done.wait [#allocation8], 512  }
  0x10   :  { %489 = vsyncadd [#allocation8], 4294966784 }
  0x11   :  { %60 = sfence }
  0x12   :  { %v63_v0 = vld [vmem:[#allocation7] sm:$0xff]  ;;  %v381_v1 = vld [vmem:[%s635_s3] ss:$0 sm:$0xff]  ;;  %vm75_vm0 = vcmask 261120   ;;  %v65_v2 = vld [vmem:[#allocation7 + $0x10] sm:$0xff]  ;;  %v89_v13 = vlaneseq  ;;  %v497_v22 = vmov 0.0  }
  0x13   :  { %v71_v3 = vmul.f32 %v381_v1, %v63_v0  ;;  %v73_v4 = vmul.f32 %v381_v1, %v65_v2  ;;  %v64_v5 = vld [vmem:[#allocation7 + $0x8] sm:$0xff]  ;;  %v66_v6 = vld [vmem:[#allocation7 + $0x18] sm:$0xff]  ;;  %s61_s2 = sld [smem:[#allocation6]]  ;;  %s498_s5 = smov 1  }
  0x14   :  { %v72_v9 = vmul.f32 %v381_v1, %v64_v5  ;;  %v74_v10 = vmul.f32 %v381_v1, %v66_v6  ;;  %v537_v14 = vld [vmem:[#allocation2] sm:$0xff]  ;;  %v539_v15 = vshrl.u32 %v89_v13, 7  ;;  %s340_s3 = sld [smem:[#allocation6 + $0x1]]  ;;  %s499_s6 = smov [#allocation9]  }
  0x15   :  { %v76_v7 = vsel %vm75_vm0, %v71_v3, 0.0  ;;  %v82_v8 = vsel %vm75_vm0, %v73_v4, 0.0  ;;  %v94_v16 = vperm.slane %v537_v14, 0  ;;  %v111_v17 = vperm.slane %v537_v14, 1  ;;  %s326_s7 = sshll.u32 %s499_s6, 4  ;;  %s328_s10 = sshll.u32 %s636_s4, 4  ;;  %s327_s7 = int_to_ptr.vmem [resolvable:$true] %s326_s7  ;;  %s329_s10 = int_to_ptr.hbm [resolvable:$true] %s328_s10 }
  0x16   :  { %77 = vadd.xlane.f32.xlu0 %v76_v7  ;;  %83 = vadd.xlane.f32.xlu1 %v82_v8  ;;  %v79_v11 = vsel %vm75_vm0, %v72_v9, 0.0  ;;  %v85_v12 = vsel %vm75_vm0, %v74_v10, 0.0  ;;  %v544_v18 = vadd.s32 16, %v539_v15  ;;  %v547_v19 = vadd.s32 8, %v539_v15 }
  0x17   :  { %v550_v20 = vadd.s32 24, %v539_v15  ;;  %vm95_vm1 = vcmp.eq.s32.totalorder %v539_v15, %v94_v16  ;;  %vm112_vm2 = vcmp.eq.s32.totalorder %v539_v15, %v111_v17  ;;  %v128_v21 = vperm.slane %v537_v14, 2 }
  0x18   :  { %vm97_vm3 = vcmp.eq.s32.totalorder %v544_v18, %v94_v16  ;;  %vm114_vm4 = vcmp.eq.s32.totalorder %v544_v18, %v111_v17  ;;  %vm96_vm5 = vcmp.eq.s32.totalorder %v547_v19, %v94_v16  ;;  %vm113_vm6 = vcmp.eq.s32.totalorder %v547_v19, %v111_v17 }
  0x19   :  { %vm98_vm7 = vcmp.eq.s32.totalorder %v550_v20, %v94_v16  ;;  %vm115_vm8 = vcmp.eq.s32.totalorder %v550_v20, %v111_v17  ;;  %v341_v23 = vsel %vm95_vm1, 1.0, %v497_v22  ;;  %v345_v24 = vsel %vm112_vm2, 1.0, %v497_v22 }
  0x1a   :  { %vm129_vm9 = vcmp.eq.s32.totalorder %v539_v15, %v128_v21  ;;  %v145_v25 = vperm.slane %v537_v14, 3  ;;  %v343_v26 = vsel %vm97_vm3, 1.0, %v497_v22  ;;  %v347_v27 = vsel %vm114_vm4, 1.0, %v497_v22 }
  0x1b   :  { %v342_v28 = vsel %vm96_vm5, 1.0, %v497_v22  ;;  %v346_v29 = vsel %vm113_vm6, 1.0, %v497_v22  ;;  %v344_v30 = vsel %vm98_vm7, 1.0, %v497_v22  ;;  %v348_v31 = vsel %vm115_vm8, 1.0, %v497_v22 }
  0x1c   :  { %v124_v32 = vadd.f32 %v345_v24, %v341_v23  ;;  %vm131_vm10 = vcmp.eq.s32.totalorder %v544_v18, %v128_v21  ;;  %vm130_vm11 = vcmp.eq.s32.totalorder %v547_v19, %v128_v21  ;;  %vm132_vm12 = vcmp.eq.s32.totalorder %v550_v20, %v128_v21 }
  0x1d   :  { %v349_v33 = vsel %vm129_vm9, 1.0, %v497_v22  ;;  %v162_v34 = vperm.slane %v537_v14, 4  ;;  %vm146_vm13 = vcmp.eq.s32.totalorder %v539_v15, %v145_v25  ;;  %v126_v35 = vadd.f32 %v347_v27, %v343_v26 }
  0x1e   :  { %80 = vadd.xlane.f32.xlu0 %v79_v11  ;;  %86 = vadd.xlane.f32.xlu1 %v85_v12  ;;  %v125_v36 = vadd.f32 %v346_v29, %v342_v28  ;;  %v127_v37 = vadd.f32 %v348_v31, %v344_v30  ;;  %v351_v38 = vsel %vm131_vm10, 1.0, %v497_v22  ;;  %v350_v39 = vsel %vm130_vm11, 1.0, %v497_v22 }
  0x1f   :  { %v352_v40 = vsel %vm132_vm12, 1.0, %v497_v22  ;;  %v141_v41 = vadd.f32 %v349_v33, %v124_v32  ;;  %vm148_vm14 = vcmp.eq.s32.totalorder %v544_v18, %v145_v25  ;;  %vm147_vm15 = vcmp.eq.s32.totalorder %v547_v19, %v145_v25 }
  0x20   :  { %vm149_vm0 = vcmp.eq.s32.totalorder %v550_v20, %v145_v25  ;;  %v353_v42 = vsel %vm146_vm13, 1.0, %v497_v22  ;;  %v179_v43 = vperm.slane %v537_v14, 5  ;;  %vm163_vm1 = vcmp.eq.s32.totalorder %v539_v15, %v162_v34 }
  0x21   :  { %v143_v44 = vadd.f32 %v351_v38, %v126_v35  ;;  %v142_v45 = vadd.f32 %v350_v39, %v125_v36  ;;  %v144_v46 = vadd.f32 %v352_v40, %v127_v37  ;;  %v355_v47 = vsel %vm148_vm14, 1.0, %v497_v22 }
  0x22   :  { %v354_v48 = vsel %vm147_vm15, 1.0, %v497_v22  ;;  %v356_v49 = vsel %vm149_vm0, 1.0, %v497_v22  ;;  %v158_v50 = vadd.f32 %v353_v42, %v141_v41  ;;  %vm165_vm2 = vcmp.eq.s32.totalorder %v544_v18, %v162_v34 }
  0x23   :  { %vm164_vm3 = vcmp.eq.s32.totalorder %v547_v19, %v162_v34  ;;  %vm166_vm4 = vcmp.eq.s32.totalorder %v550_v20, %v162_v34  ;;  %v357_v51 = vsel %vm163_vm1, 1.0, %v497_v22  ;;  %v196_v52 = vperm.slane %v537_v14, 6 }
  0x24   :  { %vm180_vm5 = vcmp.eq.s32.totalorder %v539_v15, %v179_v43  ;;  %v160_v53 = vadd.f32 %v355_v47, %v143_v44  ;;  %v159_v54 = vadd.f32 %v354_v48, %v142_v45  ;;  %v161_v55 = vadd.f32 %v356_v49, %v144_v46 }
  0x25   :  { %v359_v56 = vsel %vm165_vm2, 1.0, %v497_v22  ;;  %v358_v57 = vsel %vm164_vm3, 1.0, %v497_v22  ;;  %v360_v58 = vsel %vm166_vm4, 1.0, %v497_v22  ;;  %v175_v59 = vadd.f32 %v357_v51, %v158_v50 }
  0x26   :  { %vm182_vm6 = vcmp.eq.s32.totalorder %v544_v18, %v179_v43  ;;  %vm181_vm7 = vcmp.eq.s32.totalorder %v547_v19, %v179_v43  ;;  %vm183_vm8 = vcmp.eq.s32.totalorder %v550_v20, %v179_v43  ;;  %v361_v60 = vsel %vm180_vm5, 1.0, %v497_v22 }
  0x27   :  { %v213_v61 = vperm.slane %v537_v14, 7  ;;  %vm197_vm9 = vcmp.eq.s32.totalorder %v539_v15, %v196_v52  ;;  %v177_v62 = vadd.f32 %v359_v56, %v160_v53  ;;  %v176_v63 = vadd.f32 %v358_v57, %v159_v54 }
  0x28   :  { %v178_v0 = vadd.f32 %v360_v58, %v161_v55  ;;  %v363_v1 = vsel %vm182_vm6, 1.0, %v497_v22  ;;  %v362_v2 = vsel %vm181_vm7, 1.0, %v497_v22  ;;  %v364_v3 = vsel %vm183_vm8, 1.0, %v497_v22 }
  0x29   :  { %v192_v4 = vadd.f32 %v361_v60, %v175_v59  ;;  %vm199_vm10 = vcmp.eq.s32.totalorder %v544_v18, %v196_v52  ;;  %vm198_vm11 = vcmp.eq.s32.totalorder %v547_v19, %v196_v52  ;;  %vm200_vm12 = vcmp.eq.s32.totalorder %v550_v20, %v196_v52 }
  0x2a   :  { %v365_v5 = vsel %vm197_vm9, 1.0, %v497_v22  ;;  %vm214_vm13 = vcmp.eq.s32.totalorder %v539_v15, %v213_v61  ;;  %v194_v6 = vadd.f32 %v363_v1, %v177_v62  ;;  %v193_v7 = vadd.f32 %v362_v2, %v176_v63 }
  0x2b   :  { %v195_v8 = vadd.f32 %v364_v3, %v178_v0  ;;  %v367_v9 = vsel %vm199_vm10, 1.0, %v497_v22  ;;  %v366_v10 = vsel %vm198_vm11, 1.0, %v497_v22  ;;  %v368_v11 = vsel %vm200_vm12, 1.0, %v497_v22 }
  0x2c   :  { %v209_v12 = vadd.f32 %v365_v5, %v192_v4  ;;  %vm216_vm14 = vcmp.eq.s32.totalorder %v544_v18, %v213_v61  ;;  %vm215_vm15 = vcmp.eq.s32.totalorder %v547_v19, %v213_v61  ;;  %vm217_vm0 = vcmp.eq.s32.totalorder %v550_v20, %v213_v61 }
  0x2d   :  { %v369_v13 = vsel %vm214_vm13, 1.0, %v497_v22  ;;  %v211_v16 = vadd.f32 %v367_v9, %v194_v6  ;;  %v210_v17 = vadd.f32 %v366_v10, %v193_v7  ;;  %v212_v21 = vadd.f32 %v368_v11, %v195_v8 }
  0x2e   :  { %v371_v23 = vsel %vm216_vm14, 1.0, %v497_v22  ;;  %v370_v24 = vsel %vm215_vm15, 1.0, %v497_v22  ;;  %v372_v25 = vsel %vm217_vm0, 1.0, %v497_v22  ;;  %v226_v26 = vadd.f32 %v369_v13, %v209_v12 }
  0x2f   :  { %v228_v27 = vadd.f32 %v371_v23, %v211_v16  ;;  %v227_v18 = vadd.f32 %v370_v24, %v210_v17  ;;  %v229_v28 = vadd.f32 %v372_v25, %v212_v21  ;;  %vm234_vm1 = vcmask 64512  }
  0x30   :  { %v251_v44 = vstv %s61_s2  ;;  %v249_v46 = vstv %s340_s3  ;;  %vm304_vm2 = vcmask 7168   ;;  %vm306_vm3 = vcmask 15360  }
  0x31   :  { %v252_v48 = vmul.f32 0.0, %v251_v44  ;;  %vm308_vm4 = vcmask 23552   ;;  %vm310_vm5 = vcmask 31744   ;;  %vm312_vm6 = vcmask 39936  }
  0x32   :  { %vm314_vm7 = vcmask 48128   ;;  %vm316_vm8 = vcmask 56320   ;;  %vm319_vm9 = vcmask 57344  }
  0x89   :  { %v78_v14 = vpop.xlane.xlu0 %77  ;;  %v84_v15 = vpop.xlane.xlu1 %83 }
  0x8a   :  { %v230_v19 = vmul.f32 %v226_v26, %v78_v14  ;;  %v232_v30 = vmul.f32 %v228_v27, %v84_v15 }
  0x8c   :  { %v235_v33 = vsel %vm234_vm1, %v230_v19, 0.0  ;;  %v238_v36 = vsel %vm234_vm1, %v232_v30, 0.0 }
  0x91   :  { %v81_v20 = vpop.xlane.xlu0 %80  ;;  %v87_v29 = vpop.xlane.xlu1 %86 }
  0x92   :  { %v231_v31 = vmul.f32 %v227_v18, %v81_v20  ;;  %v233_v32 = vmul.f32 %v229_v28, %v87_v29 }
  0x94   :  { %v236_v34 = vsel %vm234_vm1, %v231_v31, 0.0  ;;  %v240_v37 = vsel %vm234_vm1, %v233_v32, 0.0 }
  0x95   :  { %v237_v35 = vadd.f32 %v236_v34, %v235_v33 }
  0x97   :  { %v239_v38 = vadd.f32 %v238_v36, %v237_v35 }
  0x99   :  { %v241_v39 = vadd.f32 %v240_v37, %v239_v38 }
  0x9b   :  { %v242_v40 = vrot.slane %v241_v39, 4 }
  0x9d   :  { %v243_v22 = vadd.f32 %v242_v40, %v241_v39 }
  0x9f   :  { %v244_v41 = vrot.slane %v243_v22, 2 }
  0xa1   :  { %v245_v42 = vadd.f32 %v244_v41, %v243_v22 }
  0xa3   :  { %v246_v43 = vrot.slane %v245_v42, 1 }
  0xa5   :  { %v247_v45 = vadd.f32 %v246_v43, %v245_v42 }
  0xa7   :  { %v248_v47 = vmul.f32 0.125, %v247_v45 }
  0xa9   :  { %v250_v49 = vadd.f32 %v249_v46, %v248_v47 }
  0xab   :  { %v253_v50 = vadd.f32 %v252_v48, %v250_v49 }
  0xad   :  { %382 = vtanh.f32 %v253_v50 }
  0xb3   :  { %v383_v51 = vpop.eup %382 }
  0xb4   :  { %v255_v52 = vmul.f32 %v383_v51, %v251_v44 }
  0xb6   :  { %257 = vrot.lane.b32.xlu2 %v255_v52, %s498_s5 }
 0x110   :  { %v258_v53 = vpop.permute.xlu2 %257 }
 0x111   :  { %v260_v54 = vadd.f32 %v258_v53, %v250_v49 }
 0x113   :  { %384 = vtanh.f32 %v260_v54 }
 0x119   :  { %v385_v55 = vpop.eup %384 }
 0x11a   :  { %v262_v56 = vmul.f32 %v385_v55, %v251_v44  ;;  %v305_v60 = vsel %vm304_vm2, %v383_v51, %v385_v55 }
 0x11c   :  { %264 = vrot.lane.b32.xlu2 %v262_v56, %s498_s5 }
 0x176   :  { %v265_v57 = vpop.permute.xlu2 %264 }
 0x177   :  { %v267_v58 = vadd.f32 %v265_v57, %v250_v49 }
 0x179   :  { %386 = vtanh.f32 %v267_v58 }
 0x17f   :  { %v387_v59 = vpop.eup %386 }
 0x180   :  { %v307_v61 = vsel %vm306_vm3, %v305_v60, %v387_v59  ;;  %v269_v62 = vmul.f32 %v387_v59, %v251_v44 }
 0x182   :  { %271 = vrot.lane.b32.xlu0 %v269_v62, %s498_s5 }
 0x1f4   :  { %v272_v63 = vpop.permute.xlu0 %271 }
 0x1f5   :  { %v274_v0 = vadd.f32 %v272_v63, %v250_v49 }
 0x1f7   :  { %388 = vtanh.f32 %v274_v0 }
 0x1fd   :  { %v389_v1 = vpop.eup %388 }
 0x1fe   :  { %v309_v2 = vsel %vm308_vm4, %v307_v61, %v389_v1  ;;  %v276_v3 = vmul.f32 %v389_v1, %v251_v44 }
 0x200   :  { %278 = vrot.lane.b32.xlu1 %v276_v3, %s498_s5 }
 0x272   :  { %v279_v4 = vpop.permute.xlu1 %278 }
 0x273   :  { %v281_v5 = vadd.f32 %v279_v4, %v250_v49 }
 0x275   :  { %390 = vtanh.f32 %v281_v5 }
 0x27b   :  { %v391_v6 = vpop.eup %390 }
 0x27c   :  { %v283_v7 = vmul.f32 %v391_v6, %v251_v44  ;;  %v311_v8 = vsel %vm310_vm5, %v309_v2, %v391_v6 }
 0x27e   :  { %285 = vrot.lane.b32.xlu2 %v283_v7, %s498_s5 }
 0x2d8   :  { %v286_v9 = vpop.permute.xlu2 %285 }
 0x2d9   :  { %v288_v10 = vadd.f32 %v286_v9, %v250_v49 }
 0x2db   :  { %392 = vtanh.f32 %v288_v10 }
 0x2e1   :  { %v393_v11 = vpop.eup %392 }
 0x2e2   :  { %v290_v12 = vmul.f32 %v393_v11, %v251_v44  ;;  %v313_v13 = vsel %vm312_vm6, %v311_v8, %v393_v11 }
 0x2e4   :  { %292 = vrot.lane.b32.xlu2 %v290_v12, %s498_s5 }
 0x33e   :  { %v293_v14 = vpop.permute.xlu2 %292 }
 0x33f   :  { %v295_v15 = vadd.f32 %v293_v14, %v250_v49 }
 0x341   :  { %394 = vtanh.f32 %v295_v15 }
 0x347   :  { %v395_v16 = vpop.eup %394 }
 0x348   :  { %v297_v17 = vmul.f32 %v395_v16, %v251_v44  ;;  %v315_v21 = vsel %vm314_vm7, %v313_v13, %v395_v16 }
 0x34a   :  { %299 = vrot.lane.b32.xlu2 %v297_v17, %s498_s5 }
 0x3a4   :  { %v300_v23 = vpop.permute.xlu2 %299 }
 0x3a5   :  { %v302_v24 = vadd.f32 %v300_v23, %v250_v49 }
 0x3a7   :  { %396 = vtanh.f32 %v302_v24 }
 0x3ad   :  { %v397_v25 = vpop.eup %396 }
 0x3ae   :  { %v317_v26 = vsel %vm316_vm8, %v315_v21, %v397_v25 }
 0x3af   :  { %398 = vtanh.f32 %v317_v26 }
 0x3b5   :  { %v399_v27 = vpop.eup %398 }
 0x3b6   :  { %320 = vst.msk [vmem:[#allocation9] sm:$0x1] %vm319_vm9, %v399_v27 }
 0x3b7   :  { %331 = dma.vmem_to_hbm [thread:$0]  %s327_s7, 16, %s329_s10, [#allocation4]  }
 0x3b8   :  { %490 = dma.done.wait [#allocation4], 16  }
 0x3b9   :  { %491 = vsyncadd [#allocation4], 4294967280 }
 0x3ba   :  { %336 = vsyncpa [#allocation3], 1 }
 0x3bb   :  { %337 = vsyncpa [#allocation8], 1 }
 0x3bc   :  { %338 = vsyncpa [#allocation4], 1 }
 0x3bd   :  { %339 = vsyncpa [#allocation5], 1 }

</bundles_post_ra>
